<compile_context>
chip_gen: v6e
topology: v6e:2x2x1
jax: 0.10.0
libtpu: 0.0.40
codegen_flags: <defaults>
</compile_context>

<pallas_src>
import jax
import jax.numpy as jnp
from jax.experimental import pallas as pl
from jax.experimental.pallas import tpu as pltpu


_H1 = 128    # fc1 width (already lane aligned)
_H2 = 64     # fc2 logical width
_H2P = 128   # fc2 padded width


def _round_up(n: int, m: int) -> int:
    return ((n + m - 1) // m) * m


def _choose_block_b(batch: int, d_pad: int) -> int:
    # Keep the double-buffered x tile under ~8 MiB so the pipeline fits the
    # scoped VMEM on every generation (incl. v7x's 64 MiB physical VMEM).
    budget = 8 * 1024 * 1024
    tb = budget // (2 * d_pad * 4)
    tb = max(8, min(512, (tb // 8) * 8))
    return min(tb, _round_up(batch, 8))


def _vmem_limit_bytes(tb: int, d_pad: int) -> int:
    need = (
        2 * tb * d_pad * 4                                   # x double buffer
        + 2 * tb * _H2P * 4                                  # out tiles + h1/h2 slack
        + 2 * (d_pad * _H1 + _H1 * _H2P + 8 * _H2P) * 4      # resident weights
    )
    return int(min(32 * 1024 * 1024, max(8 * 1024 * 1024, 2 * need)))


def _mlp_kernel(x_ref, w1_ref, w2_ref, sp_ref, o_ref):
    # x_ref : [TB, D_pad]   streamed per grid step
    # w1_ref: [D_pad, 128]  resident (constant index_map)
    # w2_ref: [128, 128]    resident (cols 64..127 zero)
    # sp_ref: [4, 128]      packed: b1 | b2(pad) | fc3 weight row (pad) | [b3, 0..]
    # o_ref : [TB, 1]
    x = x_ref[...]
    sp = sp_ref[...]
    b1 = sp[0:1, :]
    b2 = sp[1:2, :]
    w3_row = sp[2:3, :]
    b3 = sp[3:4, 0:1]

    h1 = jnp.dot(x, w1_ref[...], preferred_element_type=jnp.float32) + b1
    h1 = jnp.maximum(h1, 0.0)

    h2 = jnp.dot(h1, w2_ref[...], preferred_element_type=jnp.float32) + b2
    h2 = jnp.maximum(h2, 0.0)

    # fc3: single output unit -> lane reduction on the VPU/XLU (keeps the MXU
    # free and avoids a 1-lane MXU result pop / wasted tile).
    logits = jnp.sum(h2 * w3_row, axis=-1, keepdims=True) + b3

    # sigmoid: EUP exp + exact divide (only [TB, 1] values -> negligible cost,
    # and keeps us within tight tolerance of jax.nn.sigmoid).
    o_ref[...] = (1.0 / (1.0 + jnp.exp(-logits))).astype(o_ref.dtype)


def toxicity_discriminator(x, params, *, block_b=None):
    """Forward pass of ToxicityDiscriminator.

    x: [B, input_dim] float32
    params: dict with w1[D,128], b1[128], w2[128,64], b2[64], w3[64,1], b3[1]
    returns: [B, 1] float32 in (0, 1)
    """
    B, D = x.shape
    d_pad = _round_up(max(D, 1), 128)

    tb = block_b if block_b is not None else _choose_block_b(B, d_pad)
    b_pad = _round_up(B, tb)
    grid = (b_pad // tb,)

    # --- pack / zero-pad parameters (cheap; hoistable to init in production) ---
    w1 = jnp.zeros((d_pad, _H1), jnp.float32).at[:D, :].set(params["w1"])
    w2 = jnp.zeros((_H1, _H2P), jnp.float32).at[:, :_H2].set(params["w2"])
    small = jnp.zeros((4, _H2P), jnp.float32)
    small = small.at[0, :_H1].set(params["b1"])
    small = small.at[1, :_H2].set(params["b2"])
    small = small.at[2, :_H2].set(params["w3"][:, 0])
    small = small.at[3, 0].set(params["b3"][0])

    # --- zero-pad x to the tiled / lane-aligned shape ---
    if (b_pad, d_pad) != (B, D):
        x_in = jnp.zeros((b_pad, d_pad), jnp.float32).at[:B, :D].set(x)
    else:
        x_in = x.astype(jnp.float32)

    # TODO(synk): on v6e/v7x bandwidth-bound cases, stream x (and weights) as
    # bf16 with f32 accumulation to halve HBM traffic (needs looser tolerance).

    out = pl.pallas_call(
        _mlp_kernel,
        out_shape=jax.ShapeDtypeStruct((b_pad, 1), jnp.float32),
        grid=grid,
        in_specs=[
            pl.BlockSpec((tb, d_pad), lambda i: (i, 0)),    # x: streamed per tile
            pl.BlockSpec((d_pad, _H1), lambda i: (0, 0)),   # w1: resident
            pl.BlockSpec((_H1, _H2P), lambda i: (0, 0)),    # w2: resident
            pl.BlockSpec((4, _H2P), lambda i: (0, 0)),      # packed biases + fc3 row
        ],
        out_specs=pl.BlockSpec((tb, 1), lambda i: (i, 0)),
        compiler_params=pltpu.CompilerParams(
            dimension_semantics=("parallel",),
            vmem_limit_bytes=_vmem_limit_bytes(tb, d_pad),
        ),
    )(x_in, w1, w2, small)

    return out[:B]


def init_params(key, input_dim):
    """nn.Linear-style init (uniform +/- 1/sqrt(fan_in)); weights stored [in, out]."""
    def linear(k, fan_in, fan_out):
        kw, kb = jax.random.split(k)
        bound = 1.0 / jnp.sqrt(jnp.float32(fan_in))
        w = jax.random.uniform(kw, (fan_in, fan_out), jnp.float32, -bound, bound)
        b = jax.random.uniform(kb, (fan_out,), jnp.float32, -bound, bound)
        return w, b

    k1, k2, k3 = jax.random.split(key, 3)
    w1, b1 = linear(k1, input_dim, 128)
    w2, b2 = linear(k2, 128, 64)
    w3, b3 = linear(k3, 64, 1)
    return {"w1": w1, "b1": b1, "w2": w2, "b2": b2, "w3": w3, "b3": b3}


def _reference(x, p):
    h1 = jax.nn.relu(x @ p["w1"] + p["b1"])
    h2 = jax.nn.relu(h1 @ p["w2"] + p["b2"])
    return jax.nn.sigmoid(h2 @ p["w3"] + p["b3"])


if __name__ == "__main__":
    key = jax.random.PRNGKey(0)
    k_x, k_p = jax.random.split(key)

    batch, input_dim = 16, 32
    x = jax.random.normal(k_x, (batch, input_dim), jnp.float32)
    params = init_params(k_p, input_dim)

    out = jax.block_until_ready(toxicity_discriminator(x, params))
    ref = _reference(x, params)

    assert out.shape == (batch, 1), out.shape
    assert jnp.allclose(out, ref, atol=1e-5, rtol=1e-5), float(jnp.max(jnp.abs(out - ref)))

    print("KERNEL_OK")
</pallas_src>

<mosaic_0001>
module attributes {stable_mosaic.version = 11 : i64} {
  func.func @_mlp_kernel(%arg0: i32, %arg1: memref<16x128xf32, #tpu.memory_space<vmem>>, %arg2: memref<128x128xf32, #tpu.memory_space<vmem>>, %arg3: memref<128x128xf32, #tpu.memory_space<vmem>>, %arg4: memref<4x128xf32, #tpu.memory_space<vmem>>, %arg5: memref<16x1xf32, #tpu.memory_space<vmem>>) attributes {dimension_semantics = [#tpu.dimension_semantics<parallel>], iteration_bounds = array<i64: 1>, scalar_prefetch = 0 : i64, scratch_operands = 0 : i64, tpu.core_type = #tpu.core_type<tc>, window_params = [{transform_indices = @transform_0, window_bounds = array<i64: 16, 128>}, {pipeline_mode = #tpu.pipeline_mode<synchronous>, transform_indices = @transform_1, window_bounds = array<i64: 128, 128>}, {pipeline_mode = #tpu.pipeline_mode<synchronous>, transform_indices = @transform_2, window_bounds = array<i64: 128, 128>}, {pipeline_mode = #tpu.pipeline_mode<synchronous>, transform_indices = @transform_3, window_bounds = array<i64: 4, 128>}, {transform_indices = @transform_4, window_bounds = array<i64: 16, 1>}]} {
    %c0 = arith.constant 0 : index
    %c0_0 = arith.constant 0 : index
    %0 = vector.load %arg1[%c0, %c0_0] : memref<16x128xf32, #tpu.memory_space<vmem>>, vector<16x128xf32>
    %c0_1 = arith.constant 0 : index
    %c0_2 = arith.constant 0 : index
    %1 = vector.load %arg4[%c0_1, %c0_2] : memref<4x128xf32, #tpu.memory_space<vmem>>, vector<4x128xf32>
    %2 = vector.extract_strided_slice %1 {offsets = [0, 0], sizes = [1, 128], strides = [1, 1]} : vector<4x128xf32> to vector<1x128xf32>
    %3 = vector.extract_strided_slice %1 {offsets = [1, 0], sizes = [1, 128], strides = [1, 1]} : vector<4x128xf32> to vector<1x128xf32>
    %4 = vector.extract_strided_slice %1 {offsets = [2, 0], sizes = [1, 128], strides = [1, 1]} : vector<4x128xf32> to vector<1x128xf32>
    %5 = vector.extract_strided_slice %1 {offsets = [3, 0], sizes = [1, 1], strides = [1, 1]} : vector<4x128xf32> to vector<1x1xf32>
    %c0_3 = arith.constant 0 : index
    %c0_4 = arith.constant 0 : index
    %6 = vector.load %arg2[%c0_3, %c0_4] : memref<128x128xf32, #tpu.memory_space<vmem>>, vector<128x128xf32>
    %cst = arith.constant dense<0.000000e+00> : vector<16x128xf32>
    %7 = tpu.matmul %0, %6, %cst {dimension_numbers = #tpu.dot_dimension_numbers<[1], [0], [0], [1], [0, 0, 1, 1], [], []>} : vector<16x128xf32>, vector<128x128xf32>, vector<16x128xf32> -> vector<16x128xf32>
    %8 = vector.broadcast %2 : vector<1x128xf32> to vector<16x128xf32>
    %9 = arith.addf %7, %8 : vector<16x128xf32>
    %cst_5 = arith.constant 0.000000e+00 : f32
    %10 = vector.broadcast %cst_5 : f32 to vector<16x128xf32>
    %11 = arith.maximumf %9, %10 : vector<16x128xf32>
    %c0_6 = arith.constant 0 : index
    %c0_7 = arith.constant 0 : index
    %12 = vector.load %arg3[%c0_6, %c0_7] : memref<128x128xf32, #tpu.memory_space<vmem>>, vector<128x128xf32>
    %cst_8 = arith.constant dense<0.000000e+00> : vector<16x128xf32>
    %13 = tpu.matmul %11, %12, %cst_8 {dimension_numbers = #tpu.dot_dimension_numbers<[1], [0], [0], [1], [0, 0, 1, 1], [], []>} : vector<16x128xf32>, vector<128x128xf32>, vector<16x128xf32> -> vector<16x128xf32>
    %14 = vector.broadcast %3 : vector<1x128xf32> to vector<16x128xf32>
    %15 = arith.addf %13, %14 : vector<16x128xf32>
    %cst_9 = arith.constant 0.000000e+00 : f32
    %16 = vector.broadcast %cst_9 : f32 to vector<16x128xf32>
    %17 = arith.maximumf %15, %16 : vector<16x128xf32>
    %18 = vector.broadcast %4 : vector<1x128xf32> to vector<16x128xf32>
    %19 = arith.mulf %17, %18 : vector<16x128xf32>
    %cst_10 = arith.constant dense<0.000000e+00> : vector<16xf32>
    %20 = vector.multi_reduction <add>, %19, %cst_10 [1] : vector<16x128xf32> to vector<16xf32>
    %21 = vector.shape_cast %20 : vector<16xf32> to vector<16x1xf32>
    %22 = vector.broadcast %5 : vector<1x1xf32> to vector<16x1xf32>
    %23 = arith.addf %21, %22 : vector<16x1xf32>
    %cst_11 = arith.constant 0.000000e+00 : f32
    %24 = vector.broadcast %cst_11 : f32 to vector<16x1xf32>
    %25 = arith.subf %24, %23 : vector<16x1xf32>
    %26 = math.exp %25 : vector<16x1xf32>
    %cst_12 = arith.constant 1.000000e+00 : f32
    %27 = vector.broadcast %cst_12 : f32 to vector<16x1xf32>
    %28 = arith.addf %27, %26 : vector<16x1xf32>
    %cst_13 = arith.constant 1.000000e+00 : f32
    %29 = vector.broadcast %cst_13 : f32 to vector<16x1xf32>
    %30 = arith.divf %29, %28 : vector<16x1xf32>
    %c0_14 = arith.constant 0 : index
    %c0_15 = arith.constant 0 : index
    %31 = vector.load %arg5[%c0_14, %c0_15] : memref<16x1xf32, #tpu.memory_space<vmem>>, vector<16x1xf32>
    tpu.vector_store %arg5[%c0_14, %c0_15], %30 {strides = array<i32>} : memref<16x1xf32, #tpu.memory_space<vmem>>, vector<16x1xf32>,
    return
  }
  func.func @transform_0(%arg0: i32) -> (i32, i32) {
    %c0_i32 = arith.constant 0 : i32
    %c0_i32_0 = arith.constant 0 : i32
    return %arg0, %c0_i32 : i32, i32
  }
  func.func @transform_1(%arg0: i32) -> (i32, i32) {
    %c0_i32 = arith.constant 0 : i32
    %c0_i32_0 = arith.constant 0 : i32
    %c0_i32_1 = arith.constant 0 : i32
    return %c0_i32, %c0_i32_0 : i32, i32
  }
  func.func @transform_2(%arg0: i32) -> (i32, i32) {
    %c0_i32 = arith.constant 0 : i32
    %c0_i32_0 = arith.constant 0 : i32
    %c0_i32_1 = arith.constant 0 : i32
    return %c0_i32, %c0_i32_0 : i32, i32
  }
  func.func @transform_3(%arg0: i32) -> (i32, i32) {
    %c0_i32 = arith.constant 0 : i32
    %c0_i32_0 = arith.constant 0 : i32
    %c0_i32_1 = arith.constant 0 : i32
    return %c0_i32, %c0_i32_0 : i32, i32
  }
  func.func @transform_4(%arg0: i32) -> (i32, i32) {
    %c0_i32 = arith.constant 0 : i32
    %c0_i32_0 = arith.constant 0 : i32
    return %arg0, %c0_i32 : i32, i32
  }
}

</mosaic_0001>

<bundles_post_ra>
// kernel: tpu_custom_call.1
= control target key start
LH: loop header
LB: loop body
LE: loop exit
PB: predicated region body
PF: predicated region fallthrough
CT: control target
= control target key end

     0   :  { %9 = vsyncpa [#allocation3], 0  ;;  %s523_s0 = inlined_call_operand.hbm [shape: f32[16,128], index: 0, kind: input, shape index: {}]   ;;  %s524_s1 = inlined_call_operand.hbm [shape: f32[128,128], index: 1, kind: input, shape index: {}]   ;;  %s525_s2 = inlined_call_operand.hbm [shape: f32[128,128], index: 2, kind: input, shape index: {}]   ;;  %s526_s3 = inlined_call_operand.vmem [shape: f32[4,128], index: 3, kind: input, shape index: {}]   ;;  %s527_s4 = inlined_call_operand.vmem [shape: f32[16,1], index: 4, kind: output, shape index: {}]  }
   0x1   :  { %10 = vsyncpa [#allocation5], 0  ;;  %s475_s15 = smov [#allocation4]   ;;  %s476_s17 = smov [#allocation2]  }
   0x2   :  { %s28_s16 = sshll.u32 %s475_s15, 4  ;;  %s16_s18 = sshll.u32 %s476_s17, 4  ;;  %s29_s16 = int_to_ptr.vmem [resolvable:$true] %s28_s16  ;;  %s17_s18 = int_to_ptr.vmem [resolvable:$true] %s16_s18 }
   0x3   :  { %s419_s19 = scalar_lea.vmem %s29_s16, 2048  ;;  %p424_p1 = scmp.lt.s32.totalorder %s29_s16, %s29_s16 }
   0x4   :  { %p420_p0 = scmp.ne.s32.totalorder %s29_s16, %s419_s19  ;;  %p425_p2 = scmp.lt.s32.totalorder %s419_s19, %s419_s19 }
   0x6   :  { %p426_p3 = por %p425_p2, %p424_p1 }
   0x8   :  { %p427_p4 = pnand %p426_p3, %p420_p0 }
   0xa   :  { %430 = shalt.err (!%p427_p4)
}
   0xb   :  { %s477_s20 = smov 128   ;;  %s478_s21 = smov 8  }
   0xc   :  { %34 = dma.hbm_to_vmem [thread:$0]  %s524_s1, 2048, %s29_s16, [#allocation5], %s477_s20, %s477_s20, %s478_s21  }
   0xd   :  { %s439_s24 = scalar_lea.vmem %s17_s18, 256  ;;  %p444_p6 = scmp.lt.s32.totalorder %s17_s18, %s17_s18 }
   0xe   :  { %p440_p5 = scmp.ne.s32.totalorder %s17_s18, %s439_s24  ;;  %p445_p7 = scmp.lt.s32.totalorder %s439_s24, %s439_s24 }
  0x10   :  { %p446_p8 = por %p445_p7, %p444_p6 }
  0x12   :  { %p447_p9 = pnand %p446_p8, %p440_p5 }
  0x14   :  { %450 = shalt.err (!%p447_p9)
}
  0x15   :  { %22 = dma.hbm_to_vmem [thread:$0]  %s523_s0, 256, %s17_s18, [#allocation3], %s477_s20, %s477_s20, %s478_s21  }
  0x16   :  { %s479_s27 = smov [#allocation6]  }
  0x17   :  { %s40_s28 = sshll.u32 %s479_s27, 4  ;;  %s41_s28 = int_to_ptr.vmem [resolvable:$true] %s40_s28 }
  0x18   :  { %s459_s29 = scalar_lea.vmem %s41_s28, 2048  ;;  %p464_p11 = scmp.lt.s32.totalorder %s41_s28, %s41_s28 }
  0x19   :  { %p460_p10 = scmp.ne.s32.totalorder %s41_s28, %s459_s29  ;;  %p465_p12 = scmp.lt.s32.totalorder %s459_s29, %s459_s29 }
  0x1b   :  { %p466_p13 = por %p465_p12, %p464_p11 }
  0x1d   :  { %p467_p0 = pnand %p466_p13, %p460_p10 }
  0x1f   :  { %470 = shalt.err (!%p467_p0)
}
  0x20   :  { %46 = dma.hbm_to_vmem [thread:$0]  %s525_s2, 2048, %s41_s28, [#allocation5], %s477_s20, %s477_s20, %s478_s21  }
  0x21   :  { %471 = dma.done.wait [#allocation3], 256  }
  0x22   :  { %472 = vsyncadd [#allocation3], 4294967040 }
  0x23   :  { %473 = dma.done.wait [#allocation5], 4096  }
  0x24   :  { %474 = vsyncadd [#allocation5], 4294963200  ;;  %v76_v0 = vld [vmem:[#allocation4 + $0x78] sm:$0xff]  ;;  %v75_v1 = vld [vmem:[#allocation4 + $0x70] sm:$0xff]  ;;  %v77_v34 = vlaneseq  ;;  %vm283_vm0 = vcmask 7168  }
  0x25   :  { %328 = vmatprep.subr.mxu0 %v76_v0  ;;  %v74_v2 = vld [vmem:[#allocation4 + $0x68] sm:$0xff]  ;;  %v73_v3 = vld [vmem:[#allocation4 + $0x60] sm:$0xff]  ;;  %v58_v4 = vld [vmem:[#allocation2] sm:$0xff] }
  0x26   :  { %329 = vmatpush3.msra.mxu0 %v76_v0  ;;  %v72_v5 = vld [vmem:[#allocation4 + $0x58] sm:$0xff]  ;;  %360 = vmatprep.mubr.f32.mxu0 %v58_v4  ;;  %v172_v7 = vld [vmem:[#allocation6 + $0x70] sm:$0xff]  ;;  %v171_v9 = vld [vmem:[#allocation6 + $0x68] sm:$0xff]  ;;  %v78_v35 = vshrl.u32 %v77_v34, 7 }
  0x27   :  { %330 = vmatprep.subr.mxu0 %v75_v1  ;;  %v173_v6 = vld [vmem:[#allocation6 + $0x78] sm:$0xff]  ;;  %v71_v8 = vld [vmem:[#allocation4 + $0x50] sm:$0xff]  ;;  %v70_v10 = vld [vmem:[#allocation4 + $0x48] sm:$0xff] }
  0x28   :  { %331 = vmatpush3.msra.mxu0 %v75_v1  ;;  %363 = vmatprep.subr.mxu1 %v173_v6  ;;  %v170_v11 = vld [vmem:[#allocation6 + $0x60] sm:$0xff]  ;;  %v169_v13 = vld [vmem:[#allocation6 + $0x58] sm:$0xff]  ;;  %v168_v15 = vld [vmem:[#allocation6 + $0x50] sm:$0xff]  ;;  %v79_v36 = vsub.s32 0, %v78_v35  ;;  %v176_v45 = vsub.s32 1, %v78_v35  ;;  %v257_v48 = vsub.s32 2, %v78_v35 }
  0x29   :  { %332 = vmatprep.subr.mxu0 %v74_v2  ;;  %364 = vmatpush3.msra.mxu1 %v173_v6  ;;  %v69_v12 = vld [vmem:[#allocation4 + $0x40] sm:$0xff]  ;;  %v68_v14 = vld [vmem:[#allocation4 + $0x38] sm:$0xff]  ;;  %v67_v16 = vld [vmem:[#allocation4 + $0x30] sm:$0xff]  ;;  %v267_v57 = vsub.s32 3, %v78_v35 }
  0x2a   :  { %333 = vmatpush3.msra.mxu0 %v74_v2  ;;  %365 = vmatprep.subr.mxu1 %v172_v7  ;;  %v167_v17 = vld [vmem:[#allocation6 + $0x48] sm:$0xff]  ;;  %v166_v19 = vld [vmem:[#allocation6 + $0x40] sm:$0xff]  ;;  %v165_v21 = vld [vmem:[#allocation6 + $0x38] sm:$0xff] }
  0x2b   :  { %334 = vmatprep.subr.mxu0 %v73_v3  ;;  %366 = vmatpush3.msra.mxu1 %v172_v7  ;;  %v66_v18 = vld [vmem:[#allocation4 + $0x28] sm:$0xff]  ;;  %v65_v20 = vld [vmem:[#allocation4 + $0x20] sm:$0xff]  ;;  %v64_v22 = vld [vmem:[#allocation4 + $0x18] sm:$0xff] }
  0x2c   :  { %335 = vmatpush3.msra.mxu0 %v73_v3  ;;  %367 = vmatprep.subr.mxu1 %v171_v9  ;;  %v164_v23 = vld [vmem:[#allocation6 + $0x30] sm:$0xff]  ;;  %v163_v25 = vld [vmem:[#allocation6 + $0x28] sm:$0xff]  ;;  %v162_v27 = vld [vmem:[#allocation6 + $0x20] sm:$0xff] }
  0x2d   :  { %336 = vmatprep.subr.mxu0 %v72_v5  ;;  %368 = vmatpush3.msra.mxu1 %v171_v9  ;;  %v63_v24 = vld [vmem:[#allocation4 + $0x10] sm:$0xff]  ;;  %v62_v26 = vld [vmem:[#allocation4 + $0x8] sm:$0xff]  ;;  %v61_v28 = vld [vmem:[#allocation4] sm:$0xff] }
  0x2e   :  { %337 = vmatpush3.msra.mxu0 %v72_v5  ;;  %369 = vmatprep.subr.mxu1 %v170_v11  ;;  %v59_v29 = vld [vmem:[#allocation2 + $0x8] sm:$0xff]  ;;  %v160_v31 = vld [vmem:[#allocation6 + $0x10] sm:$0xff]  ;;  %v159_v32 = vld [vmem:[#allocation6 + $0x8] sm:$0xff] }
  0x2f   :  { %338 = vmatprep.subr.mxu0 %v71_v8  ;;  %370 = vmatpush3.msra.mxu1 %v170_v11  ;;  %v161_v30 = vld [vmem:[#allocation6 + $0x18] sm:$0xff]  ;;  %v158_v33 = vld [vmem:[#allocation6] sm:$0xff]  ;;  %v60_v37 = vld [vmem:[%s526_s3] sm:$0xf] }
  0x30   :  { %339 = vmatpush3.msra.mxu0 %v71_v8  ;;  %371 = vmatprep.subr.mxu1 %v169_v13  ;;  %v80_v38 = vrot.slane %v60_v37, %v79_v36  ;;  %v177_v46 = vrot.slane %v60_v37, %v176_v45  ;;  %v258_v53 = vrot.slane %v60_v37, %v257_v48 }
  0x31   :  { %340 = vmatprep.subr.mxu0 %v70_v10  ;;  %372 = vmatpush3.msra.mxu1 %v169_v13  ;;  %v268_v58 = vrot.slane %v60_v37, %v267_v57 }
  0x32   :  { %341 = vmatpush3.msra.mxu0 %v70_v10  ;;  %373 = vmatprep.subr.mxu1 %v168_v15 }
  0x33   :  { %342 = vmatprep.subr.mxu0 %v69_v12  ;;  %374 = vmatpush3.msra.mxu1 %v168_v15 }
  0x34   :  { %343 = vmatpush3.msra.mxu0 %v69_v12  ;;  %375 = vmatprep.subr.mxu1 %v167_v17 }
  0x35   :  { %344 = vmatprep.subr.mxu0 %v68_v14  ;;  %376 = vmatpush3.msra.mxu1 %v167_v17 }
  0x36   :  { %345 = vmatpush3.msra.mxu0 %v68_v14  ;;  %377 = vmatprep.subr.mxu1 %v166_v19 }
  0x37   :  { %346 = vmatprep.subr.mxu0 %v67_v16  ;;  %378 = vmatpush3.msra.mxu1 %v166_v19 }
  0x38   :  { %347 = vmatpush3.msra.mxu0 %v67_v16  ;;  %379 = vmatprep.subr.mxu1 %v165_v21 }
  0x39   :  { %348 = vmatprep.subr.mxu0 %v66_v18  ;;  %380 = vmatpush3.msra.mxu1 %v165_v21 }
  0x3a   :  { %349 = vmatpush3.msra.mxu0 %v66_v18  ;;  %381 = vmatprep.subr.mxu1 %v164_v23 }
  0x3b   :  { %350 = vmatprep.subr.mxu0 %v65_v20  ;;  %382 = vmatpush3.msra.mxu1 %v164_v23 }
  0x3c   :  { %351 = vmatpush3.msra.mxu0 %v65_v20  ;;  %383 = vmatprep.subr.mxu1 %v163_v25 }
  0x3d   :  { %352 = vmatprep.subr.mxu0 %v64_v22  ;;  %384 = vmatpush3.msra.mxu1 %v163_v25 }
  0x3e   :  { %353 = vmatpush3.msra.mxu0 %v64_v22  ;;  %385 = vmatprep.subr.mxu1 %v162_v27 }
  0x3f   :  { %354 = vmatprep.subr.mxu0 %v63_v24  ;;  %386 = vmatpush3.msra.mxu1 %v162_v27 }
  0x40   :  { %355 = vmatpush3.msra.mxu0 %v63_v24  ;;  %387 = vmatprep.subr.mxu1 %v161_v30 }
  0x41   :  { %356 = vmatprep.subr.mxu0 %v62_v26  ;;  %388 = vmatpush3.msra.mxu1 %v161_v30 }
  0x42   :  { %357 = vmatpush3.msra.mxu0 %v62_v26  ;;  %389 = vmatprep.subr.mxu1 %v160_v31 }
  0x43   :  { %358 = vmatprep.subr.mxu0 %v61_v28  ;;  %390 = vmatpush3.msra.mxu1 %v160_v31 }
  0x44   :  { %359 = vmatpush3.msra.mxu0 %v61_v28  ;;  %391 = vmatprep.subr.mxu1 %v159_v32 }
  0x45   :  { %361 = vmatmul.mubr.f32.vlgmr.msra.gmra.mxu0 %v59_v29  ;;  %392 = vmatpush3.msra.mxu1 %v159_v32 }
  0x46   :  { %393 = vmatprep.subr.mxu1 %v158_v33 }
  0x47   :  { %394 = vmatpush3.msra.mxu1 %v158_v33 }
 0x105   :  { %v362_v39 = vpop.f32.mrf.mxu0 }
 0x106   :  { %v153_v40 = vadd.f32 %v362_v39, %v80_v38 }
 0x107   :  { %v147_v41 = vpop.f32.mrf.mxu0 }
 0x108   :  { %v148_v42 = vadd.f32 %v147_v41, %v80_v38  ;;  %v157_v44 = vmax.f32 %v153_v40, 0.0 }
 0x10a   :  { %v156_v43 = vmax.f32 %v148_v42, 0.0 }
 0x10c   :  { %395 = vmatprep.mubr.f32.mxu1 %v156_v43 }
 0x10d   :  { %396 = vmatmul.mubr.f32.vlgmr.msra.gmra.mxu1 %v157_v44 }
 0x1cd   :  { %v397_v47 = vpop.f32.mrf.mxu1 }
 0x1ce   :  { %v250_v50 = vadd.f32 %v397_v47, %v177_v46 }
 0x1cf   :  { %v244_v49 = vpop.f32.mrf.mxu1 }
 0x1d0   :  { %v245_v51 = vadd.f32 %v244_v49, %v177_v46  ;;  %v254_v54 = vmax.f32 %v250_v50, 0.0 }
 0x1d2   :  { %v253_v52 = vmax.f32 %v245_v51, 0.0  ;;  %v260_v56 = vmul.f32 %v258_v53, %v254_v54 }
 0x1d4   :  { %v259_v55 = vmul.f32 %v258_v53, %v253_v52 }
 0x1d6   :  { %261 = vadd.xlane.f32.xlu0 %v259_v55 }
 0x1da   :  { %263 = vadd.xlane.f32.xlu0 %v260_v56 }
 0x25f   :  { %v262_v59 = vpop.xlane.xlu0 %261 }
 0x260   :  { %v269_v60 = vadd.f32 %v268_v58, %v262_v59 }
 0x262   :  { %v271_v61 = vsub.f32 0.0, %v269_v60 }
 0x263   :  { %v264_v62 = vpop.xlane.xlu0 %263 }
 0x264   :  { %v273_v63 = vmul.f32 1.442695, %v271_v61  ;;  %v270_v0 = vadd.f32 %v268_v58, %v264_v62 }
 0x266   :  { %403 = vpow2.f32 %v273_v63  ;;  %v272_v1 = vsub.f32 0.0, %v270_v0 }
 0x268   :  { %v275_v2 = vmul.f32 1.442695, %v272_v1 }
 0x26a   :  { %405 = vpow2.f32 %v275_v2 }
 0x273   :  { %v404_v3 = vpop.eup %403 }
 0x274   :  { %v277_v4 = vadd.f32 1.0, %v404_v3 }
 0x276   :  { %407 = vrcp.f32 %v277_v4 }
 0x277   :  { %v406_v5 = vpop.eup %405 }
 0x278   :  { %v278_v6 = vadd.f32 1.0, %v406_v5 }
 0x27a   :  { %409 = vrcp.f32 %v278_v6 }
 0x283   :  { %v408_v7 = vpop.eup %407 }
 0x284   :  { %284 = vst.msk [vmem:[%s527_s4] sm:$0xff] %vm283_vm0, %v408_v7 }
 0x287   :  { %v410_v8 = vpop.eup %409 }
 0x288   :  { %285 = vst.msk [vmem:[%s527_s4 + $0x8] sm:$0xff] %vm283_vm0, %v410_v8 }
 0x289   :  { %290 = vsyncpa [#allocation3], 1 }
 0x28a   :  { %291 = vsyncpa [#allocation5], 1 }

</bundles_post_ra>
